<compile_context>
chip_gen: v6e
topology: v6e:2x2x1
jax: 0.10.0
libtpu: 0.0.40
codegen_flags: <defaults>
</compile_context>

<pallas_src>
import jax
import jax.numpy as jnp
from jax import lax
from jax.experimental import pallas as pl
from jax.experimental.pallas import tpu as pltpu

LANE = 128


def _make_kernel(C, HW, THW, nk, reg_carry):
    n_chunks = THW // LANE
    tail_start = (nk - 1) * THW
    has_partial_tail = (nk * THW != HW)

    def _plan(is_tail):
        # Static (trace-time) list of (chunk index, #valid lanes) to process.
        plan = []
        for j in range(n_chunks):
            if is_tail:
                g0 = tail_start + j * LANE
                if g0 >= HW:
                    break                      # fully out of bounds: skip
                plan.append((j, min(LANE, HW - g0)))
            else:
                plan.append((j, LANE))
        return plan

    def kernel(x_ref, w1_ref, w2_ref, out_ref, sum_acc, max_acc):
        # x_ref  : (1, C, THW)    w1_ref : (C, Cr)    w2_ref : (Cr, C)
        # out_ref: (1, 1, C)      sum_acc/max_acc : (1, C, LANE) f32 scratch
        k = pl.program_id(1)

        @pl.when(k == 0)
        def _init():
            sum_acc[...] = jnp.zeros_like(sum_acc)
            max_acc[...] = jnp.full_like(max_acc, -jnp.inf)

        def run(is_tail):
            if reg_carry:
                s = sum_acc[...]
                m = max_acc[...]
            for j, nv in _plan(is_tail):
                chunk = x_ref[:, :, j * LANE:(j + 1) * LANE].astype(jnp.float32)
                if nv < LANE:
                    # Trace-time-constant lane mask: only the single partial
                    # tail chunk pays these extra VALU ops.
                    lane = lax.broadcasted_iota(jnp.int32, chunk.shape, 2)
                    valid = lane < nv
                    cs = jnp.where(valid, chunk, 0.0)
                    cm = jnp.where(valid, chunk, -jnp.inf)
                else:
                    cs = chunk
                    cm = chunk
                if reg_carry:
                    s = s + cs
                    m = jnp.maximum(m, cm)
                else:
                    sum_acc[...] += cs
                    max_acc[...] = jnp.maximum(max_acc[...], cm)
            if reg_carry:
                sum_acc[...] = s
                max_acc[...] = m

        if has_partial_tail and nk > 1:
            @pl.when(k < nk - 1)
            def _fast():
                run(False)

            @pl.when(k == nk - 1)
            def _tail():
                run(True)
        else:
            # Either every block is fully in-bounds, or there is a single
            # grid step (which is then always the tail).
            run(has_partial_tail)

        @pl.when(k == nk - 1)
        def _finalize():
            # One cross-lane (XLU) reduce each, once per batch element.
            avg = jnp.sum(sum_acc[...], axis=-1) * (1.0 / HW)    # (1, C)
            mx = jnp.max(max_acc[...], axis=-1)                  # (1, C)
            w1 = w1_ref[...].astype(jnp.float32)                 # (C, Cr)
            w2 = w2_ref[...].astype(jnp.float32)                 # (Cr, C)
            stacked = jnp.concatenate([avg, mx], axis=0)         # (2, C)
            h = jnp.maximum(
                jnp.dot(stacked, w1, preferred_element_type=jnp.float32), 0.0)
            y = jnp.dot(h, w2, preferred_element_type=jnp.float32)  # (2, C)
            att = jax.nn.sigmoid(y[0:1] + y[1:2])                # (1, C)
            out_ref[...] = jnp.reshape(att, out_ref.shape).astype(out_ref.dtype)

    return kernel


def channel_attention(x, w1, w2, *, target_tile_bytes=8 << 20):
    """x: (B, C, H, W).  w1: (Cr, C, 1, 1).  w2: (C, Cr, 1, 1).

    Returns the sigmoid channel-attention map of shape (B, C, 1, 1),
    matching the PyTorch ChannelAttention module.  Feed bf16 x to halve HBM
    traffic (accumulation stays f32).
    """
    B, C, H, W = x.shape
    Cr = w1.shape[0]
    HW = H * W

    # Free metadata reshape -- no HBM copy, no padding.
    x_flat = x.reshape(B, C, HW)

    # Spatial tile: a multiple of 128 lanes near target_tile_bytes.  No
    # divisibility requirement on HW; the last grid step handles the ragged
    # tail with an in-kernel mask.
    bytes_per_elem = jnp.dtype(x.dtype).itemsize
    eff_target = min(int(target_tile_bytes), 16 << 20)   # keep 2x tile < ~32 MiB
    chunk_bytes = C * bytes_per_elem * LANE
    total_chunks = -(-HW // LANE)
    n_per_tile = max(1, min(eff_target // chunk_bytes, total_chunks))
    THW = n_per_tile * LANE
    nk = -(-HW // THW)

    # Explicit scoped-VMEM budget: enough for double-buffered x tiles +
    # weights + scratch, capped so it fits v7x's 64 MiB physical VMEM (v5e /
    # v6e physical is 128 MiB, so this is safe everywhere).
    tile_bytes = C * THW * bytes_per_elem
    w_bytes = 2 * C * Cr * jnp.dtype(w1.dtype).itemsize
    scratch_bytes = 2 * C * LANE * 4
    out_bytes = C * bytes_per_elem
    needed = 2 * (tile_bytes + w_bytes + out_bytes) + scratch_bytes + (2 << 20)
    vmem_limit_bytes = int(min(48 << 20, max(32 << 20, needed)))

    # PyTorch conv weight (out, in, 1, 1) -> matmul weight (in, out).
    w1_mat = w1.reshape(Cr, C).T   # (C, Cr)
    w2_mat = w2.reshape(C, Cr).T   # (Cr, C)

    # Register-carried accumulators only while they comfortably fit in vregs.
    reg_carry = C <= 128

    kernel = _make_kernel(C, HW, THW, nk, reg_carry)

    out = pl.pallas_call(
        kernel,
        out_shape=jax.ShapeDtypeStruct((B, 1, C), x.dtype),
        grid_spec=pltpu.PrefetchScalarGridSpec(
            num_scalar_prefetch=0,
            grid=(B, nk),
            in_specs=[
                pl.BlockSpec((1, C, THW), lambda b, k: (b, 0, k)),
                pl.BlockSpec((C, Cr), lambda b, k: (0, 0)),
                pl.BlockSpec((Cr, C), lambda b, k: (0, 0)),
            ],
            out_specs=pl.BlockSpec((1, 1, C), lambda b, k: (b, 0, 0)),
            scratch_shapes=[
                pltpu.VMEM((1, C, LANE), jnp.float32),   # running sum
                pltpu.VMEM((1, C, LANE), jnp.float32),   # running max
            ],
        ),
        compiler_params=pltpu.CompilerParams(
            dimension_semantics=("parallel", "arbitrary"),
            vmem_limit_bytes=vmem_limit_bytes),
    )(x_flat, w1_mat, w2_mat)

    return out.reshape(B, C, 1, 1)


def channel_attention_ref(x, w1, w2):
    """Pure-JAX reference mirroring the PyTorch module."""
    B, C, H, W = x.shape
    Cr = w1.shape[0]
    w1_mat = w1.reshape(Cr, C)
    w2_mat = w2.reshape(C, Cr)
    avg = jnp.mean(x, axis=(2, 3))       # (B, C)
    mx = jnp.max(x, axis=(2, 3))         # (B, C)

    def mlp(v):
        h = jnp.maximum(v @ w1_mat.T, 0.0)
        return h @ w2_mat.T

    return jax.nn.sigmoid(mlp(avg) + mlp(mx)).reshape(B, C, 1, 1)


if __name__ == "__main__":
    key = jax.random.PRNGKey(0)
    kx1, kx2, k1, k2 = jax.random.split(key, 4)

    C, ratio = 32, 16          # in_planes=32, ratio=16 -> hidden=2
    Cr = C // ratio
    w1 = jax.random.normal(k1, (Cr, C, 1, 1), dtype=jnp.float32) * 0.1
    w2 = jax.random.normal(k2, (C, Cr, 1, 1), dtype=jnp.float32) * 0.1

    # Case 1: HW a multiple of 128, single grid step (no tail masking).
    x1 = jax.random.normal(kx1, (2, C, 16, 16), dtype=jnp.float32)
    out1 = jax.block_until_ready(channel_attention(x1, w1, w2))
    ref1 = channel_attention_ref(x1, w1, w2)
    assert out1.shape == (2, C, 1, 1)
    assert jnp.allclose(out1, ref1, atol=1e-5, rtol=1e-5), "case1 mismatch"

    # Case 2: ragged spatial size (14x14 = 196) with a deliberately tiny tile
    # so the kernel exercises the multi-step grid, the unmasked fast path,
    # the masked tail chunk, and the init/finalize accumulator logic.
    x2 = jax.random.normal(kx2, (2, C, 14, 14), dtype=jnp.float32)
    out2 = jax.block_until_ready(
        channel_attention(x2, w1, w2, target_tile_bytes=C * 4 * LANE))
    ref2 = channel_attention_ref(x2, w1, w2)
    assert out2.shape == (2, C, 1, 1)
    assert jnp.allclose(out2, ref2, atol=1e-5, rtol=1e-5), "case2 mismatch"

    print("KERNEL_OK")
</pallas_src>

<mosaic_0001>
module attributes {stable_mosaic.version = 11 : i64} {
  func.func @kernel(%arg0: i32, %arg1: i32, %arg2: memref<1x32x256xf32, #tpu.memory_space<vmem>>, %arg3: memref<32x2xf32, #tpu.memory_space<vmem>>, %arg4: memref<2x32xf32, #tpu.memory_space<vmem>>, %arg5: memref<1x1x32xf32, #tpu.memory_space<vmem>>, %arg6: memref<1x32x128xf32, #tpu.memory_space<vmem>>, %arg7: memref<1x32x128xf32, #tpu.memory_space<vmem>>) attributes {dimension_semantics = [#tpu.dimension_semantics<parallel>, #tpu.dimension_semantics<arbitrary>], iteration_bounds = array<i64: 2, 1>, scalar_prefetch = 0 : i64, scratch_operands = 2 : i64, tpu.core_type = #tpu.core_type<tc>, window_params = [{transform_indices = @transform_0, window_bounds = array<i64: 1, 32, 256>}, {pipeline_mode = #tpu.pipeline_mode<synchronous>, transform_indices = @transform_1, window_bounds = array<i64: 32, 2>}, {pipeline_mode = #tpu.pipeline_mode<synchronous>, transform_indices = @transform_2, window_bounds = array<i64: 2, 32>}, {transform_indices = @transform_3, window_bounds = array<i64: 1, 1, 32>}]} {
    %c0_i32 = arith.constant 0 : i32
    %0 = arith.cmpi eq, %arg1, %c0_i32 : i32
    %1 = arith.extui %0 : i1 to i32
    %c0_i32_0 = arith.constant 0 : i32
    %2 = arith.cmpi ne, %1, %c0_i32_0 : i32
    scf.if %2 {
      %cst = arith.constant 0.000000e+00 : f32
      %16 = vector.broadcast %cst : f32 to vector<1x32x128xf32>
      %c0_19 = arith.constant 0 : index
      %c0_20 = arith.constant 0 : index
      %c0_21 = arith.constant 0 : index
      %17 = vector.load %arg6[%c0_19, %c0_20, %c0_21] : memref<1x32x128xf32, #tpu.memory_space<vmem>>, vector<1x32x128xf32>
      tpu.vector_store %arg6[%c0_19, %c0_20, %c0_21], %16 {strides = array<i32>} : memref<1x32x128xf32, #tpu.memory_space<vmem>>, vector<1x32x128xf32>,
      %cst_22 = arith.constant 0xFF800000 : f32
      %18 = vector.broadcast %cst_22 : f32 to vector<1x32x128xf32>
      %c0_23 = arith.constant 0 : index
      %c0_24 = arith.constant 0 : index
      %c0_25 = arith.constant 0 : index
      %19 = vector.load %arg7[%c0_23, %c0_24, %c0_25] : memref<1x32x128xf32, #tpu.memory_space<vmem>>, vector<1x32x128xf32>
      tpu.vector_store %arg7[%c0_23, %c0_24, %c0_25], %18 {strides = array<i32>} : memref<1x32x128xf32, #tpu.memory_space<vmem>>, vector<1x32x128xf32>,
    } else {
    }
    %c0 = arith.constant 0 : index
    %c0_1 = arith.constant 0 : index
    %c0_2 = arith.constant 0 : index
    %3 = vector.load %arg6[%c0, %c0_1, %c0_2] : memref<1x32x128xf32, #tpu.memory_space<vmem>>, vector<1x32x128xf32>
    %c0_3 = arith.constant 0 : index
    %c0_4 = arith.constant 0 : index
    %c0_5 = arith.constant 0 : index
    %4 = vector.load %arg7[%c0_3, %c0_4, %c0_5] : memref<1x32x128xf32, #tpu.memory_space<vmem>>, vector<1x32x128xf32>
    %c0_6 = arith.constant 0 : index
    %c0_7 = arith.constant 0 : index
    %c0_8 = arith.constant 0 : index
    %5 = vector.load %arg2[%c0_6, %c0_7, %c0_8] : memref<1x32x256xf32, #tpu.memory_space<vmem>>, vector<1x32x128xf32>
    %6 = arith.addf %3, %5 : vector<1x32x128xf32>
    %7 = arith.maximumf %4, %5 : vector<1x32x128xf32>
    %c0_9 = arith.constant 0 : index
    %c0_10 = arith.constant 0 : index
    %c128 = arith.constant 128 : index
    %8 = vector.load %arg2[%c0_9, %c0_10, %c128] : memref<1x32x256xf32, #tpu.memory_space<vmem>>, vector<1x32x128xf32>
    %9 = arith.addf %6, %8 : vector<1x32x128xf32>
    %10 = arith.maximumf %7, %8 : vector<1x32x128xf32>
    %c0_11 = arith.constant 0 : index
    %c0_12 = arith.constant 0 : index
    %c0_13 = arith.constant 0 : index
    %11 = vector.load %arg6[%c0_11, %c0_12, %c0_13] : memref<1x32x128xf32, #tpu.memory_space<vmem>>, vector<1x32x128xf32>
    tpu.vector_store %arg6[%c0_11, %c0_12, %c0_13], %9 {strides = array<i32>} : memref<1x32x128xf32, #tpu.memory_space<vmem>>, vector<1x32x128xf32>,
    %c0_14 = arith.constant 0 : index
    %c0_15 = arith.constant 0 : index
    %c0_16 = arith.constant 0 : index
    %12 = vector.load %arg7[%c0_14, %c0_15, %c0_16] : memref<1x32x128xf32, #tpu.memory_space<vmem>>, vector<1x32x128xf32>
    tpu.vector_store %arg7[%c0_14, %c0_15, %c0_16], %10 {strides = array<i32>} : memref<1x32x128xf32, #tpu.memory_space<vmem>>, vector<1x32x128xf32>,
    %c0_i32_17 = arith.constant 0 : i32
    %13 = arith.cmpi eq, %arg1, %c0_i32_17 : i32
    %14 = arith.extui %13 : i1 to i32
    %c0_i32_18 = arith.constant 0 : i32
    %15 = arith.cmpi ne, %14, %c0_i32_18 : i32
    scf.if %15 {
      %c0_19 = arith.constant 0 : index
      %c0_20 = arith.constant 0 : index
      %c0_21 = arith.constant 0 : index
      %16 = vector.load %arg6[%c0_19, %c0_20, %c0_21] : memref<1x32x128xf32, #tpu.memory_space<vmem>>, vector<1x32x128xf32>
      %cst = arith.constant dense<0.000000e+00> : vector<1x32xf32>
      %17 = vector.multi_reduction <add>, %16, %cst [2] : vector<1x32x128xf32> to vector<1x32xf32>
      %cst_22 = arith.constant 3.906250e-03 : f32
      %18 = vector.broadcast %cst_22 : f32 to vector<1x32xf32>
      %19 = arith.mulf %17, %18 : vector<1x32xf32>
      %c0_23 = arith.constant 0 : index
      %c0_24 = arith.constant 0 : index
      %c0_25 = arith.constant 0 : index
      %20 = vector.load %arg7[%c0_23, %c0_24, %c0_25] : memref<1x32x128xf32, #tpu.memory_space<vmem>>, vector<1x32x128xf32>
      %cst_26 = arith.constant dense<0xFF800000> : vector<1x32xf32>
      %21 = vector.multi_reduction <maximumf>, %20, %cst_26 [2] : vector<1x32x128xf32> to vector<1x32xf32>
      %c0_27 = arith.constant 0 : index
      %c0_28 = arith.constant 0 : index
      %22 = vector.load %arg3[%c0_27, %c0_28] : memref<32x2xf32, #tpu.memory_space<vmem>>, vector<32x2xf32>
      %c0_29 = arith.constant 0 : index
      %c0_30 = arith.constant 0 : index
      %23 = vector.load %arg4[%c0_29, %c0_30] : memref<2x32xf32, #tpu.memory_space<vmem>>, vector<2x32xf32>
      %24 = tpu.concatenate %19, %21 in 0 : vector<1x32xf32>, vector<1x32xf32> -> vector<2x32xf32>
      %cst_31 = arith.constant dense<0.000000e+00> : vector<2x2xf32>
      %25 = tpu.matmul %24, %22, %cst_31 {dimension_numbers = #tpu.dot_dimension_numbers<[1], [0], [0], [1], [0, 0, 1, 1], [], []>} : vector<2x32xf32>, vector<32x2xf32>, vector<2x2xf32> -> vector<2x2xf32>
      %cst_32 = arith.constant 0.000000e+00 : f32
      %26 = vector.broadcast %cst_32 : f32 to vector<2x2xf32>
      %27 = arith.maximumf %25, %26 : vector<2x2xf32>
      %cst_33 = arith.constant dense<0.000000e+00> : vector<2x32xf32>
      %28 = tpu.matmul %27, %23, %cst_33 {dimension_numbers = #tpu.dot_dimension_numbers<[1], [0], [0], [1], [0, 0, 1, 1], [], []>} : vector<2x2xf32>, vector<2x32xf32>, vector<2x32xf32> -> vector<2x32xf32>
      %29 = vector.extract_strided_slice %28 {offsets = [0, 0], sizes = [1, 32], strides = [1, 1]} : vector<2x32xf32> to vector<1x32xf32>
      %30 = vector.extract_strided_slice %28 {offsets = [1, 0], sizes = [1, 32], strides = [1, 1]} : vector<2x32xf32> to vector<1x32xf32>
      %31 = arith.addf %29, %30 : vector<1x32xf32>
      %32 = arith.negf %31 : vector<1x32xf32>
      %33 = math.exp %32 : vector<1x32xf32>
      %cst_34 = arith.constant 1.000000e+00 : f32
      %34 = vector.broadcast %cst_34 : f32 to vector<1x32xf32>
      %35 = arith.addf %34, %33 : vector<1x32xf32>
      %36 = arith.divf %34, %35 : vector<1x32xf32>
      %37 = vector.shape_cast %36 : vector<1x32xf32> to vector<1x1x32xf32>
      %c0_35 = arith.constant 0 : index
      %c0_36 = arith.constant 0 : index
      %c0_37 = arith.constant 0 : index
      %38 = vector.load %arg5[%c0_35, %c0_36, %c0_37] : memref<1x1x32xf32, #tpu.memory_space<vmem>>, vector<1x1x32xf32>
      tpu.vector_store %arg5[%c0_35, %c0_36, %c0_37], %37 {strides = array<i32>} : memref<1x1x32xf32, #tpu.memory_space<vmem>>, vector<1x1x32xf32>,
    } else {
    }
    return
  }
  func.func @transform_0(%arg0: i32, %arg1: i32) -> (i32, i32, i32) {
    %c0_i32 = arith.constant 0 : i32
    %c0_i32_0 = arith.constant 0 : i32
    return %arg0, %c0_i32, %arg1 : i32, i32, i32
  }
  func.func @transform_1(%arg0: i32, %arg1: i32) -> (i32, i32) {
    %c0_i32 = arith.constant 0 : i32
    %c0_i32_0 = arith.constant 0 : i32
    %c0_i32_1 = arith.constant 0 : i32
    return %c0_i32, %c0_i32_0 : i32, i32
  }
  func.func @transform_2(%arg0: i32, %arg1: i32) -> (i32, i32) {
    %c0_i32 = arith.constant 0 : i32
    %c0_i32_0 = arith.constant 0 : i32
    %c0_i32_1 = arith.constant 0 : i32
    return %c0_i32, %c0_i32_0 : i32, i32
  }
  func.func @transform_3(%arg0: i32, %arg1: i32) -> (i32, i32, i32) {
    %c0_i32 = arith.constant 0 : i32
    %c0_i32_0 = arith.constant 0 : i32
    %c0_i32_1 = arith.constant 0 : i32
    return %arg0, %c0_i32, %c0_i32_0 : i32, i32, i32
  }
}

</mosaic_0001>

<bundles_post_ra>
// kernel: tpu_custom_call.1
= control target key start
LH: loop header
LB: loop body
LE: loop exit
PB: predicated region body
PF: predicated region fallthrough
CT: control target
= control target key end

     0   :  { %8 = vsyncpa [#allocation5], 0  ;;  %s1008_s0 = inlined_call_operand.hbm [shape: f32[2,32,256], index: 0, kind: input, shape index: {}]   ;;  %s1009_s1 = inlined_call_operand.vmem [shape: f32[32,2], index: 1, kind: input, shape index: {}]   ;;  %s1010_s2 = inlined_call_operand.vmem [shape: f32[2,32], index: 2, kind: input, shape index: {}]   ;;  %s1011_s3 = inlined_call_operand.hbm [shape: f32[2,1,32], index: 3, kind: output, shape index: {}]  }
   0x1   :  { %10 = vsyncpa [#allocation5 + $0x1], 0 }
   0x2   :  { %11 = vsyncpa [#allocation6], 0 }
   0x3   :  { %13 = vsyncpa [#allocation6 + $0x1], 0  ;;  %s852_s12 = smov 0   ;;  %s854_s13 = smov 0  }
   0x4   :  { %s856_s14 = smov 0   ;;  %s858_s15 = smov 0  }
   0x5   :  { %s860_s16 = smov 0   ;;  %s862_s17 = smov 0  }
   0x6 LB: > { %s606_s18 = sadd.s32 4294967295, %s824_s17   ;;  %s607_s19 = sadd.s32 4294967294, %s824_s17   ;;  %s824_s17 = sphi %s862_s17, %s19_s17   ;;  %s820_s16 = sphi %s860_s16, %s1022_s16   ;;  %s816_s15 = sphi %s858_s15, %s1021_s15   ;;  %s812_s14 = sphi %s856_s14, %s1020_s14   ;;  %s808_s13 = sphi %s854_s13, %s1019_s13   ;;  %s804_s12 = sphi %s852_s12, %s1018_s12  }
   0x7   : > { %s31_s20 = sadd.s32 1, %s820_s16  ;;  %s40_s21 = sadd.s32 1, %s812_s14 }
   0x8   : > { %p33_p0 = scmp.ge.s32.totalorder %s31_s20, 2  ;;  %p47_p1 = scmp.ne.s32.totalorder %s812_s14, %s808_s13 }
   0x9   : > { %p48_p2 = scmp.eq.s32.totalorder %s824_s17, 0  ;;  %p53_p3 = scmp.ne.s32.totalorder %s808_s13, %s804_s12 }
   0xa   : > { %s1024_s20 = smov (%p33_p0, %s31_s20), 0  ;;  %p54_p5 = scmp.eq.s32.totalorder %s606_s18, 0 }
   0xb   : > { %p893_p4 = por %p48_p2, %p47_p1  ;;  %s35_s23 = ssub.s32 %s820_s16, %s1024_s20 }
   0xc   : > { %p119_p6 = scmp.eq.s32.totalorder %s606_s18, 1  ;;  %p38_p7 = scmp.eq.s32.totalorder %s35_s23, 0 }
   0xd   : > { %p899_p8 = por %p54_p5, %p53_p3  ;;  %p125_p10 = scmp.eq.s32.totalorder %s607_s19, 1 }
   0xe   : > { %p903_p9 = por %p119_p6, %p47_p1  ;;  %p658_p13 = scmp.lt.s32.totalorder %s824_s17, 2 }
   0xf   : > { %s908_s26 = scalar_select %p38_p7, %s812_s14, %s40_s21  }
  0x10   : > { %p910_p11 = por %p125_p10, %p53_p3  ;;  %s151_s28 = sand.u32 1, %s812_s14  }
  0x11   : > { %s610_s29 = sshll.u32 %s151_s28, 6  ;;  %s622_s30 = sshll.u32 %s820_s16, 10 }
  0x12   : > { %s163_s6 = scalar_lea.hbm %s1008_s0, %s622_s30  ;;  %s155_s7 = scalar_lea.vmem [#allocation4], %s610_s29 }
  0x13   : > { %s164_s8 = sshll.u32 %s155_s7, 4  ;;  %p923_p0 = pnand %p658_p13, %p893_p4  ;;  %s165_s8 = int_to_ptr.vmem [resolvable:$true] %s164_s8 }
  0x14   : > { %p613_p1 = scmp.ge.s32.totalorder %s824_s17, 1  ;;  %s152_s10 = scalar_lea.sflag [#allocation5], %s151_s28 }
  0x15   : > { %p718_p2 = pneg %p923_p0  ;;  %s729_s11 = scalar_lea.vmem %s165_s8, 1024 }
  0x16   : > { %p730_p3 = scmp.ne.s32.totalorder %s165_s8, %s729_s11  ;;  %s826_s18 = smov [#allocation4]  }
  0x17   : > { %s734_s19 = sshll.u32 %s826_s18, 4  ;;  %s735_s19 = int_to_ptr.vmem [resolvable:$false] %s734_s19 }
  0x18   : > { %p732_p5 = pnand %p730_p3, %p718_p2  ;;  %s736_s21 = scalar_lea.vmem %s735_s19, 2048 }
  0x19   : > { %p737_p7 = scmp.lt.s32.totalorder %s165_s8, %s735_s19  ;;  %p738_p10 = scmp.lt.s32.totalorder %s736_s21, %s729_s11 }
  0x1a   : > { %p733_p6 = pneg %p732_p5 }
  0x1b   : > { %p739_p12 = por %p738_p10, %p737_p7 }
  0x1d   : > { %p740_p4 = pnand %p739_p12, %p733_p6 }
  0x1f   : > { %743 = shalt.err (!%p740_p4)
}
  0x20   : > { %s827_s22 = smov 256   ;;  %s828_s23 = smov 16  }
  0x21   : > { %653 = dma.hbm_to_vmem [thread:$0]  (!%p923_p0), %s163_s6, 1024, %s165_s8, %s152_s10, %s827_s22, %s827_s22, %s828_s23  }
  0x22   : > { %p172_p13 = scmp.lt.s32.totalorder %s824_s17, 3 }
  0x24   : > { %p173_p2 = pnand %p613_p1, %p172_p13 }
  0x25   : > { %s936_s28 = sand.u32 (!%p173_p2), 1, %s808_s13  }
  0x26   : > { %176 = sbr.rel (%p173_p2) target bundleno = 640 (0x280), region = 32  ;;  %s614_s29 = sshll.u32 (!%p173_p2), %s936_s28, 6 }
  0x27   : > { %s179_s30 = scalar_lea.sflag (!%p173_p2), [#allocation5], %s936_s28  ;;  %s182_s4 = scalar_lea.vmem (!%p173_p2), [#allocation4], %s614_s29 }
  0x2b   : > { %795 = dma.done.wait (%p899_p8), %s179_s30, 1024  }
  0x2c   : > { %797 = vsyncadd (%p899_p8), %s179_s30, 4294966272  ;;  %v227_v0 = vld [vmem:[%s182_s4 + $0x20] sm:$0xff]  ;;  %v239_v1 = vld [vmem:[%s182_s4 + $0x28] sm:$0xff]  ;;  %v829_v16 = vmov 0.0   ;;  %vm830_vm0 = vmmov 0   ;;  %v297_v21 = vlaneseq  ;;  %vm308_vm1 = vcmask 130112  }
  0x2d   : > { %v225_v2 = vld [vmem:[%s182_s4] sm:$0xff]  ;;  %v243_v3 = vadd.f32 %v239_v1, %v227_v0  ;;  %v237_v4 = vld [vmem:[%s182_s4 + $0x8] sm:$0xff]  ;;  %v228_v5 = vld [vmem:[%s182_s4 + $0x30] sm:$0xff]  ;;  %v247_v15 = vmax.f32 %v227_v0, %v239_v1  ;;  %630 = vmatprep.subr.mxu0 %v829_v16  ;;  %641 = vmatprep.subr.mxu1 %v829_v16  ;;  %vm315_vm2 = vcmask 195712   ;;  %vm322_vm3 = vcmask 261312   ;;  %s619_s21 = sshll.u32 %s816_s15, 4 }
  0x2e   : > { %v240_v6 = vld [vmem:[%s182_s4 + $0x38] sm:$0xff]  ;;  %v241_v7 = vadd.f32 %v237_v4, %v225_v2  ;;  %v226_v8 = vld [vmem:[%s182_s4 + $0x10] sm:$0xff]  ;;  %v245_v13 = vmax.f32 %v225_v2, %v237_v4  ;;  %v289_v19 = vld [vmem:[%s1009_s1 + $0x8] sm:$0xff]  ;;  %638 = vmatprep.mubr.msk.f32.mxu0 %vm830_vm0, %v829_v16  ;;  %643 = vmatprep.mubr.msk.f32.mxu1 %vm830_vm0, %v829_v16  ;;  %v298_v22 = vand.u32 127, %v297_v21  ;;  %v300_v25 = vshrl.u32 %v297_v21, 7  ;;  %s203_s22 = scalar_lea.vmem [#allocation7], %s936_s28 }
  0x2f   : > { %v238_v9 = vld [vmem:[%s182_s4 + $0x18] sm:$0xff]  ;;  %268 = vadd.xlane.f32.xlu1 %v243_v3  ;;  %v244_v10 = vadd.f32 %v240_v6, %v228_v5  ;;  %v248_v14 = vmax.f32 %v228_v5, %v240_v6  ;;  %v290_v18 = vld [vmem:[%s1009_s1 + $0x10] sm:$0xff]  ;;  %v288_v20 = vld [vmem:[%s1009_s1] sm:$0xff]  ;;  %vm349_vm4 = vcmask 1040384   ;;  %vm351_vm5 = vcmask 261120   ;;  %s529_s23 = sshll.u32 %s203_s22, 4  ;;  %s966_s4 = scalar_lea.hbm %s1011_s3, %s619_s21  ;;  %s530_s23 = int_to_ptr.vmem [resolvable:$true] %s529_s23 }
  0x30   : > { %264 = vadd.xlane.f32.xlu0 %v241_v7  ;;  %v242_v11 = vadd.f32 %v238_v9, %v226_v8  ;;  %v246_v12 = vmax.f32 %v226_v8, %v238_v9  ;;  %v291_v17 = vld [vmem:[%s1009_s1 + $0x18] sm:$0xff]  ;;  %v303_v24 = vadd.s32 4294967288, %v298_v22  ;;  %v310_v27 = vadd.s32 4294967280, %v298_v22  ;;  %v292_v58 = vld [vmem:[%s1010_s2] sm:$0x3]  ;;  %s517_s24 = scalar_lea.sflag [#allocation6], %s936_s28 }
  0x31   : > { %631 = vmatpush3.msra.mxu0 %v291_v17  ;;  %v301_v30 = vsub.s32 %v298_v22, %v300_v25  ;;  %v317_v32 = vadd.s32 4294967272, %v298_v22  ;;  %vm430_vm6 = vcmask 1041408   ;;  %vm426_vm7 = vcmask 15360   ;;  %s744_s5 = scalar_lea.vmem %s530_s23, 16  ;;  %s831_s6 = smov [#allocation7]  }
  0x32   : > { %632 = vmatprep.subr.mxu0 %v829_v16  ;;  %v306_v29 = vsub.s32 %v303_v24, %v300_v25  ;;  %v313_v35 = vsub.s32 %v310_v27, %v300_v25  ;;  %642 = vmatpush3.msk.msra.mxu1 %vm430_vm6, %v292_v58  ;;  %vm514_vm8 = vcmask 253952   ;;  %p745_p8 = scmp.ne.s32.totalorder %s530_s23, %s744_s5  ;;  %s748_s7 = sshll.u32 %s831_s6, 4  ;;  %s749_s7 = int_to_ptr.vmem [resolvable:$false] %s748_s7 }
  0x33   : > { %270 = vadd.xlane.f32.xlu1 %v244_v10  ;;  %633 = vmatpush3.msra.mxu0 %v290_v18  ;;  %v320_v40 = vsub.s32 %v317_v32, %v300_v25  ;;  %s750_s15 = scalar_lea.vmem %s749_s7, 32  ;;  %p751_p1 = scmp.lt.s32.totalorder %s530_s23, %s749_s7 }
  0x34   : > { %266 = vadd.xlane.f32.xlu0 %v242_v11  ;;  %634 = vmatprep.subr.mxu0 %v829_v16  ;;  %p746_p12 = pnand %p745_p8, %p903_p9  ;;  %p752_p3 = scmp.lt.s32.totalorder %s750_s15, %s744_s5 }
  0x35   : > { %635 = vmatpush3.msra.mxu0 %v289_v19 }
  0x36   : > { %636 = vmatprep.subr.mxu0 %v829_v16  ;;  %p747_p0 = pneg %p746_p12  ;;  %p753_p5 = por %p752_p3, %p751_p1 }
  0x37   : > { %282 = vmax.xlane.f32.xlu1 %v246_v12  ;;  %637 = vmatpush3.msra.mxu0 %v288_v20 }
  0x38   : > { %280 = vmax.xlane.f32.xlu0 %v245_v13  ;;  %p754_p6 = pnand %p753_p5, %p747_p0 }
  0x3b   : > { %286 = vmax.xlane.f32.xlu1 %v248_v14 }
  0x3c   : > { %284 = vmax.xlane.f32.xlu0 %v247_v15 }
  0xb8   : > { %v269_v23 = vpop.xlane.xlu1 %268 }
  0xb9   : > { %v265_v26 = vpop.xlane.xlu0 %264  ;;  %v274_v36 = vmul.f32 0.00390625, %v269_v23 }
  0xba   : > { %v272_v31 = vmul.f32 0.00390625, %v265_v26 }
  0xbb   : > { %v314_v46 = vrot.slane %v274_v36, %v313_v35 }
  0xbc   : > { %v271_v28 = vpop.xlane.xlu1 %270  ;;  %v302_v39 = vrot.slane %v272_v31, %v301_v30 }
  0xbd   : > { %v267_v33 = vpop.xlane.xlu0 %266  ;;  %v275_v41 = vmul.f32 0.00390625, %v271_v28 }
  0xbe   : > { %v273_v34 = vmul.f32 0.00390625, %v267_v33 }
  0xbf   : > { %v321_v48 = vrot.slane %v275_v41, %v320_v40 }
  0xc0   : > { %v307_v37 = vrot.slane %v273_v34, %v306_v29  ;;  %v283_v38 = vpop.xlane.xlu1 %282 }
  0xc1   : > { %v281_v42 = vpop.xlane.xlu0 %280  ;;  %v336_v44 = vrot.slane %v283_v38, %v306_v29 }
  0xc2   : > { %v309_v43 = vsel %vm308_vm1, %v307_v37, %v302_v39  ;;  %v332_v45 = vrot.slane %v281_v42, %v301_v30 }
  0xc3   : > { %v316_v52 = vsel %vm315_vm2, %v314_v46, %v309_v43 }
  0xc4   : > { %v287_v47 = vpop.xlane.xlu1 %286  ;;  %v337_v53 = vsel %vm308_vm1, %v336_v44, %v332_v45  ;;  %v323_v56 = vsel %vm322_vm3, %v321_v48, %v316_v52 }
  0xc5   : > { %v285_v49 = vpop.xlane.xlu0 %284  ;;  %v346_v50 = vrot.slane %v287_v47, %v320_v40 }
  0xc6   : > { %v341_v51 = vrot.slane %v285_v49, %v313_v35 }
  0xc8   : > { %v342_v54 = vsel %vm315_vm2, %v341_v51, %v337_v53 }
  0xc9   : > { %v347_v55 = vsel %vm322_vm3, %v346_v50, %v342_v54 }
  0xca   : > { %v350_v57 = vsel %vm349_vm4, %v323_v56, %v347_v55 }
  0xcb   : > { %639 = vmatmul.mubr.msk.f32.vlgmr.msra.gmra.mxu0 %vm351_vm5, %v350_v57 }
 0x18b   : > { %v421_v59 = vpop.f32.mrf.mxu0 }
 0x18c   : > { %v425_v60 = vmax.f32 %v421_v59, 0.0 }
 0x18d   : > { %v640_v61 = vpop.f32.mrf.mxu0 }
 0x18e   : > { %644 = vmatmul.mubr.msk.f32.vlgmr.msra.gmra.mxu1 %vm426_vm7, %v425_v60 }
 0x24e   : > { %v500_v62 = vpop.f32.mrf.mxu1 }
 0x24f   : > { %v505_v63 = vrot.slane %v500_v62, 1 }
 0x250   : > { %v645_v0 = vpop.f32.mrf.mxu1 }
 0x251   : > { %v507_v1 = vadd.f32 %v505_v63, %v500_v62 }
 0x253   : > { %v618_v2 = vmul.f32 -1.442695, %v507_v1 }
 0x255   : > { %712 = vpow2.f32 %v618_v2 }
 0x262   : > { %v713_v3 = vpop.eup %712 }
 0x263   : > { %v511_v4 = vadd.f32 1.0, %v713_v3 }
 0x265   : > { %714 = vrcp.f32 %v511_v4 }
 0x272   : > { %v715_v5 = vpop.eup %714 }
 0x273   : > { %515 = vst.msk [vmem:[%s203_s22] sm:$0x1] %vm514_vm8, %v715_v5 }
 0x274   : > { %757 = shalt.err (!%p754_p6)
}
 0x275   : > { %s758_s8 = scalar_lea.hbm %s966_s4, 16  ;;  %s762_s10 = scalar_lea.hbm %s1011_s3, 32 }
 0x276   : > { %p759_p7 = scmp.ne.s32.totalorder %s966_s4, %s758_s8  ;;  %p763_p13 = scmp.lt.s32.totalorder %s966_s4, %s1011_s3 }
 0x277   : > { %p764_p2 = scmp.lt.s32.totalorder %s762_s10, %s758_s8 }
 0x278   : > { %p760_p10 = pnand %p759_p7, %p903_p9 }
 0x279   : > { %p765_p8 = por %p764_p2, %p763_p13 }
 0x27a   : > { %p761_p4 = pneg %p760_p10 }
 0x27c   : > { %p766_p12 = pnand %p765_p8, %p761_p4 }
 0x27e   : > { %769 = shalt.err (!%p766_p12)
}
 0x27f   : > { %648 = dma.vmem_to_hbm [thread:$0]  (%p903_p9), %s530_s23, 16, %s966_s4, %s517_s24  }
 0x280 PF: > { %s541_s19 = sand.u32 1, %s804_s12   ;;  %p1017_p0 = scmp.ge.s32.totalorder %s824_s17, 2 }
 0x281   : > { %s542_s21 = scalar_lea.sflag [#allocation6], %s541_s19 }
 0x282   : > { %p655_p1 = pnand %p1017_p0, %p910_p11 }
 0x284   : > { %p656_p3 = pneg %p655_p1 }
 0x286   : > { %799 = dma.done.wait (%p656_p3), %s542_s21, 16  }
 0x287   : > { %801 = vsyncadd (%p656_p3), %s542_s21, 4294967280  ;;  %s19_s17 = sadd.s32 1, %s824_s17   ;;  %s1018_s12 = smov %s808_s13 }
 0x288   : > { %p16_p5 = scmp.ge.s32.totalorder %s19_s17, 4   ;;  %s1019_s13 = smov %s812_s14 }
 0x289   : > { %s1020_s14 = smov %s908_s26  ;;  %s1021_s15 = smov %s820_s16 }
 0x28a   : > { %s1022_s16 = smov %s1024_s20  ;;  %18 = sbr.rel (!%p16_p5) target bundleno = 6 (0x6), region = 85 }
 0x28f   :  { %546 = vsyncpa [#allocation5], 1 }
 0x290   :  { %548 = vsyncpa [#allocation5 + $0x1], 1 }
 0x291   :  { %549 = vsyncpa [#allocation6], 1 }
 0x292   :  { %551 = vsyncpa [#allocation6 + $0x1], 1 }

</bundles_post_ra>
